<compile_context>
chip_gen: v7x
topology: tpu7x:2x2x1
jax: 0.10.0
libtpu: 0.0.40
codegen_flags: <defaults>
</compile_context>

<pallas_src>
import functools
import math

import jax
import jax.numpy as jnp
from jax.experimental import pallas as pl
from jax.experimental.pallas import tpu as pltpu


_VMEM_LIMIT = 40 * 1024 * 1024          # safe on v5e/v6e (128 MiB) and v7x (64 MiB)
_FUSED_MAX_F32_BYTES = 2 * 1024 * 1024  # fused single-pass gate (f32 working set)
_TILE_BYTES = 4 * 1024 * 1024           # target per-input-buffer DMA size
_TILE_MAX_ELEMS = 2 * 1024 * 1024       # cap so f32 temporaries stay <= 8 MiB/tile


def _round_up(a, b):
    return ((a + b - 1) // b) * b


def _fused_bn_kernel(x_ref, gamma_ref, beta_ref, o_ref, *, n, eps):
    """Whole (N, F) activation resident in VMEM: stats + normalize in one pass."""
    xt = x_ref[...].astype(jnp.float32)                       # (N, F)
    inv_n = 1.0 / n
    mean = jnp.sum(xt, axis=0, keepdims=True) * inv_n          # (1, F)
    ex2 = jnp.sum(xt * xt, axis=0, keepdims=True) * inv_n
    var = jnp.maximum(ex2 - mean * mean, 0.0)                  # biased; clamp f32 cancellation
    invstd = jax.lax.rsqrt(var + eps)
    scale = gamma_ref[...] * invstd                            # folded affine
    shift = beta_ref[...] - mean * scale
    o_ref[...] = (xt * scale + shift).astype(o_ref.dtype)


def _stats_kernel(x_ref, sum_ref, sq_ref, *, tn, half, np_rows):
    """Per-lane sum / sum-of-squares accumulated over the inner (row) grid axis."""
    c = pl.program_id(0)      # core-split index ("parallel")
    i = pl.program_id(1)      # row-tile index within this half ("arbitrary")

    @pl.when(i == 0)
    def _():
        sum_ref[...] = jnp.zeros_like(sum_ref)
        sq_ref[...] = jnp.zeros_like(sq_ref)

    # Logical tile index.  The input index_map clamps the DMA to the last real
    # tile; the mask below zeroes everything past the true row count, which
    # covers both the ragged last tile and the fully-out-of-range logical tile
    # the 2-way split produces when the tile count is odd.
    t = c * half + i
    rows_left = np_rows - t * tn                               # may be <= 0
    row_idx = jax.lax.broadcasted_iota(jnp.int32, x_ref.shape, 0)
    xt = x_ref[...].astype(jnp.float32)
    xm = jnp.where(row_idx < rows_left, xt, 0.0)
    sum_ref[...] += jnp.sum(xm, axis=0, keepdims=True)         # (1, fw)
    sq_ref[...] += jnp.sum(xm * xm, axis=0, keepdims=True)


def _norm_kernel(x_ref, scale_ref, shift_ref, o_ref):
    """y = x * scale + shift; (1, fw) vectors broadcast over the row tile."""
    xt = x_ref[...].astype(jnp.float32)
    o_ref[...] = (xt * scale_ref[...] + shift_ref[...]).astype(o_ref.dtype)


@functools.partial(
    jax.jit, static_argnames=("eps", "force_two_pass", "max_tile_rows"))
def modified_batchnorm1d(x, gamma, beta, eps=1e-5, force_two_pass=False,
                         max_tile_rows=None):
    og_shape = x.shape
    f = gamma.shape[-1]                       # in_features
    assert x.size % f == 0
    n = x.size // f                           # per-feature sample count
    x2 = x.reshape(n, f)                      # free reshape: features on lanes

    gamma_f = gamma.astype(jnp.float32).reshape(1, f)
    beta_f = beta.astype(jnp.float32).reshape(1, f)

    # ------------- fused single-pass path (activation fits in VMEM) ---------
    if (n * f * 4 <= _FUSED_MAX_F32_BYTES) and not force_two_pass:
        y = pl.pallas_call(
            functools.partial(_fused_bn_kernel, n=n, eps=eps),
            out_shape=jax.ShapeDtypeStruct((n, f), x.dtype),
            compiler_params=pltpu.CompilerParams(
                vmem_limit_bytes=_VMEM_LIMIT),
        )(x2, gamma_f, beta_f)
        return y.reshape(og_shape)

    # ------------- two-pass path ---------------------------------------------
    # Lane packing: (N, F) -> (N/k, k*F) with k*F a multiple of 128 whenever k
    # divides N.  F=32 -> k=4 (fw=128), F=48 -> k=8 (fw=384), F=96 -> k=4, ...
    k = 1
    if f < 128:
        kc = 128 // math.gcd(f, 128)
        if n % kc == 0:
            k = kc
    fw = k * f
    np_rows = n // k
    xp = x2.reshape(np_rows, fw)              # free, layout-identical reshape

    # Row tile: ~4 MiB of input per buffer (sized from the itemsize), capped so
    # the in-kernel f32 temporaries stay bounded; multiple of the sublane pack.
    itemsize = jnp.dtype(x.dtype).itemsize
    sub = {4: 8, 2: 16, 1: 32}.get(itemsize, 8)
    elems = min(_TILE_BYTES // itemsize, _TILE_MAX_ELEMS)
    tn = max(sub, (elems // fw) // sub * sub)
    tn = min(tn, _round_up(np_rows, sub))
    if max_tile_rows is not None:
        tn = max(sub, min(tn, max_tile_rows))
    n_tiles = pl.cdiv(np_rows, tn)

    # 2-way row split so megacore chips (v7x) can put one half on each
    # TensorCore; degenerates to a plain sequential loop on v5e/v6e.
    nc = 2 if n_tiles >= 2 else 1
    half = pl.cdiv(n_tiles, nc)
    last_tile = n_tiles - 1

    # --- pass 1: per-lane partial sums / sums-of-squares ---------------------
    s, sq = pl.pallas_call(
        functools.partial(_stats_kernel, tn=tn, half=half, np_rows=np_rows),
        out_shape=(
            jax.ShapeDtypeStruct((nc, 1, fw), jnp.float32),
            jax.ShapeDtypeStruct((nc, 1, fw), jnp.float32),
        ),
        grid_spec=pltpu.PrefetchScalarGridSpec(
            num_scalar_prefetch=0,
            grid=(nc, half),
            in_specs=[
                pl.BlockSpec(
                    (tn, fw),
                    lambda c, i: (jnp.minimum(c * half + i, last_tile), 0)),
            ],
            out_specs=(
                pl.BlockSpec((None, 1, fw), lambda c, i: (c, 0, 0)),
                pl.BlockSpec((None, 1, fw), lambda c, i: (c, 0, 0)),
            ),
        ),
        compiler_params=pltpu.CompilerParams(
            dimension_semantics=("parallel", "arbitrary"),
            vmem_limit_bytes=_VMEM_LIMIT,
        ),
    )(xp)

    # --- tiny per-feature glue in plain XLA ----------------------------------
    s_f = s.sum(axis=(0, 1)).reshape(k, f).sum(axis=0)         # (F,)
    sq_f = sq.sum(axis=(0, 1)).reshape(k, f).sum(axis=0)       # (F,)
    mean = s_f / n
    # TODO(synk): E[x^2]-E[x]^2 in f32 can lose accuracy vs a centered variance
    # when |mean| >> std; the clamp only keeps rsqrt well-defined.
    var = jnp.maximum(sq_f / n - mean * mean, 0.0)             # biased variance
    invstd = jax.lax.rsqrt(var + eps)
    scale = gamma_f.reshape(-1) * invstd                       # folded affine
    shift = beta_f.reshape(-1) - mean * scale
    scale_w = jnp.tile(scale.reshape(1, f), (1, k))            # (1, fw) lane layout
    shift_w = jnp.tile(shift.reshape(1, f), (1, k))

    # --- pass 2: y = x * scale + shift (partial last block: OOB stores drop) -
    yp = pl.pallas_call(
        _norm_kernel,
        out_shape=jax.ShapeDtypeStruct((np_rows, fw), x.dtype),
        grid_spec=pltpu.PrefetchScalarGridSpec(
            num_scalar_prefetch=0,
            grid=(n_tiles,),
            in_specs=[
                pl.BlockSpec((tn, fw), lambda i: (i, 0)),
                pl.BlockSpec((1, fw), lambda i: (0, 0)),
                pl.BlockSpec((1, fw), lambda i: (0, 0)),
            ],
            out_specs=pl.BlockSpec((tn, fw), lambda i: (i, 0)),
        ),
        compiler_params=pltpu.CompilerParams(
            dimension_semantics=("parallel",),
            vmem_limit_bytes=_VMEM_LIMIT,
        ),
    )(xp, scale_w, shift_w)

    # TODO(synk): running_mean / running_var state updates of training-mode
    # BatchNorm1d are stateful side effects and are not produced here.
    return yp.reshape(og_shape)


def _reference(x, gamma, beta, eps=1e-5):
    f = gamma.shape[-1]
    x2 = x.reshape(-1, f).astype(jnp.float32)
    mean = x2.mean(axis=0, keepdims=True)
    var = x2.var(axis=0, keepdims=True)                        # biased
    y = (x2 - mean) * jax.lax.rsqrt(var + eps) * gamma.reshape(1, f) \
        + beta.reshape(1, f)
    return y.reshape(x.shape).astype(x.dtype)


if __name__ == "__main__":
    key = jax.random.PRNGKey(0)
    kx, kg, kb, kx2 = jax.random.split(key, 4)

    F = 32                                    # in_features
    gamma = 1.0 + 0.1 * jax.random.normal(kg, (F,), dtype=jnp.float32)
    beta = 0.1 * jax.random.normal(kb, (F,), dtype=jnp.float32)

    # (1) small activation -> fused single-pass kernel.
    x_small = jax.random.normal(kx, (2, 8, F), dtype=jnp.float32)
    out_small = jax.block_until_ready(modified_batchnorm1d(x_small, gamma, beta))
    ref_small = _reference(x_small, gamma, beta)
    assert out_small.shape == x_small.shape and out_small.dtype == x_small.dtype
    assert jnp.allclose(out_small, ref_small, atol=1e-5, rtol=1e-5)

    # (2) same semantics through the tiled two-pass path; small tiles force a
    #     multi-tile grid with a ragged last tile and the 2-way core split.
    x_big = jax.random.normal(kx2, (2, 80, F), dtype=jnp.float32)
    out_big = jax.block_until_ready(
        modified_batchnorm1d(x_big, gamma, beta,
                             force_two_pass=True, max_tile_rows=16))
    ref_big = _reference(x_big, gamma, beta)
    assert out_big.shape == x_big.shape and out_big.dtype == x_big.dtype
    assert jnp.allclose(out_big, ref_big, atol=1e-5, rtol=1e-5)

    print("KERNEL_OK")
</pallas_src>

<mosaic_0001>
module attributes {stable_mosaic.version = 11 : i64} {
  func.func @_fused_bn_kernel(%arg0: memref<16x32xf32, #tpu.memory_space<vmem>>, %arg1: memref<1x32xf32, #tpu.memory_space<vmem>>, %arg2: memref<1x32xf32, #tpu.memory_space<vmem>>, %arg3: memref<16x32xf32, #tpu.memory_space<vmem>>) attributes {dimension_semantics = [], scalar_prefetch = 0 : i64, scratch_operands = 0 : i64, tpu.core_type = #tpu.core_type<tc>} {
    %c0 = arith.constant 0 : index
    %c0_0 = arith.constant 0 : index
    %0 = vector.load %arg0[%c0, %c0_0] : memref<16x32xf32, #tpu.memory_space<vmem>>, vector<16x32xf32>
    %cst = arith.constant dense<0.000000e+00> : vector<32xf32>
    %1 = vector.multi_reduction <add>, %0, %cst [0] : vector<16x32xf32> to vector<32xf32>
    %2 = vector.shape_cast %1 : vector<32xf32> to vector<1x32xf32>
    %cst_1 = arith.constant 6.250000e-02 : f32
    %3 = vector.broadcast %cst_1 : f32 to vector<1x32xf32>
    %4 = arith.mulf %2, %3 : vector<1x32xf32>
    %5 = arith.mulf %0, %0 : vector<16x32xf32>
    %cst_2 = arith.constant dense<0.000000e+00> : vector<32xf32>
    %6 = vector.multi_reduction <add>, %5, %cst_2 [0] : vector<16x32xf32> to vector<32xf32>
    %7 = vector.shape_cast %6 : vector<32xf32> to vector<1x32xf32>
    %cst_3 = arith.constant 6.250000e-02 : f32
    %8 = vector.broadcast %cst_3 : f32 to vector<1x32xf32>
    %9 = arith.mulf %7, %8 : vector<1x32xf32>
    %10 = arith.mulf %4, %4 : vector<1x32xf32>
    %11 = arith.subf %9, %10 : vector<1x32xf32>
    %cst_4 = arith.constant 0.000000e+00 : f32
    %12 = vector.broadcast %cst_4 : f32 to vector<1x32xf32>
    %13 = arith.maximumf %11, %12 : vector<1x32xf32>
    %cst_5 = arith.constant 9.99999974E-6 : f32
    %14 = vector.broadcast %cst_5 : f32 to vector<1x32xf32>
    %15 = arith.addf %13, %14 : vector<1x32xf32>
    %16 = math.rsqrt %15 : vector<1x32xf32>
    %c0_6 = arith.constant 0 : index
    %c0_7 = arith.constant 0 : index
    %17 = vector.load %arg1[%c0_6, %c0_7] : memref<1x32xf32, #tpu.memory_space<vmem>>, vector<1x32xf32>
    %18 = arith.mulf %17, %16 : vector<1x32xf32>
    %c0_8 = arith.constant 0 : index
    %c0_9 = arith.constant 0 : index
    %19 = vector.load %arg2[%c0_8, %c0_9] : memref<1x32xf32, #tpu.memory_space<vmem>>, vector<1x32xf32>
    %20 = arith.mulf %4, %18 : vector<1x32xf32>
    %21 = arith.subf %19, %20 : vector<1x32xf32>
    %22 = vector.broadcast %18 : vector<1x32xf32> to vector<16x32xf32>
    %23 = arith.mulf %0, %22 : vector<16x32xf32>
    %24 = vector.broadcast %21 : vector<1x32xf32> to vector<16x32xf32>
    %25 = arith.addf %23, %24 : vector<16x32xf32>
    %c0_10 = arith.constant 0 : index
    %c0_11 = arith.constant 0 : index
    %26 = vector.load %arg3[%c0_10, %c0_11] : memref<16x32xf32, #tpu.memory_space<vmem>>, vector<16x32xf32>
    tpu.vector_store %arg3[%c0_10, %c0_11], %25 {strides = array<i32>} : memref<16x32xf32, #tpu.memory_space<vmem>>, vector<16x32xf32>,
    return
  }
}

</mosaic_0001>

<bundles_post_ra>
// kernel: modified_batchnorm1d.1
= control target key start
LH: loop header
LB: loop body
LE: loop exit
PB: predicated region body
PF: predicated region fallthrough
CT: control target
= control target key end

     0   :  { %8 = vsyncpa [#allocation3], 0  ;;  %s219_s0 = inlined_call_operand.hbm [shape: f32[16,32], index: 0, kind: input, shape index: {}]   ;;  %s220_s1 = inlined_call_operand.vmem [shape: f32[1,32], index: 1, kind: input, shape index: {}]   ;;  %s221_s2 = inlined_call_operand.vmem [shape: f32[1,32], index: 2, kind: input, shape index: {}]   ;;  %s222_s3 = inlined_call_operand.hbm [shape: f32[16,32], index: 3, kind: output, shape index: {}]  }
   0x1   :  { %9 = vsyncpa [#allocation4], 0  ;;  %s153_s12 = smov [#allocation2]   ;;  %s105_s16 = scalar_lea.hbm %s219_s0, 256 }
   0x2   :  { %s15_s13 = sshll.u32 %s153_s12, 4  ;;  %p106_p0 = scmp.ne.s32.totalorder %s219_s0, %s105_s16  ;;  %s16_s13 = int_to_ptr.vmem [resolvable:$true] %s15_s13 }
   0x3   :  { %p109_p1 = scmp.lt.u32.totalorder %s105_s16, %s219_s0 }
   0x5   :  { %p111_p2 = pnand %p109_p1, %p106_p0 }
   0x7   :  { %114 = shalt.err (!%p111_p2)
}
   0x8   :  { %s115_s21 = scalar_lea.vmem %s16_s13, 256  ;;  %p120_p4 = scmp.lt.s32.totalorder %s16_s13, %s16_s13 }
   0x9   :  { %p116_p3 = scmp.ne.s32.totalorder %s16_s13, %s115_s21  ;;  %p121_p5 = scmp.lt.s32.totalorder %s115_s21, %s115_s21 }
   0xb   :  { %p122_p6 = por %p121_p5, %p120_p4 }
   0xd   :  { %p123_p7 = pnand %p122_p6, %p116_p3 }
   0xf   :  { %126 = shalt.err (!%p123_p7)
}
  0x10   :  { %s154_s22 = smov 128   ;;  %s155_s23 = smov 8  }
  0x11   :  { %21 = dma.hbm_to_vmem [thread:$0]  %s219_s0, 256, %s16_s13, [#allocation3], %s154_s22, %s154_s22, %s155_s23  }
  0x12   :  { %149 = dma.done.wait [#allocation3], 256  }
  0x13   :  { %150 = vsyncadd [#allocation3], 4294967040  ;;  %vm31_vm0 = vcmask 261120   ;;  %v29_v0 = vld [vmem:[#allocation2] sm:$0xff]  ;;  %v30_v1 = vld [vmem:[#allocation2 + $0x8] sm:$0xff]  ;;  %v65_v28 = vlaneseq  ;;  %s156_s29 = smov [#allocation5]  }
  0x14   :  { %v32_v2 = vsel %vm31_vm0, %v29_v0, 0.0  ;;  %v33_v3 = vsel %vm31_vm0, %v30_v1, 0.0  ;;  %v42_v4 = vmul.f32 %v29_v0, %v29_v0  ;;  %v43_v5 = vmul.f32 %v30_v1, %v30_v1  ;;  %v59_v30 = vld [vmem:[%s220_s1] sm:$0x1]  ;;  %s87_s30 = sshll.u32 %s156_s29, 4  ;;  %s88_s30 = int_to_ptr.vmem [resolvable:$true] %s87_s30 }
  0x15   :  { %v34_v6 = vadd.f32 %v33_v3, %v32_v2  ;;  %v66_v29 = vshrl.u32 %v65_v28, 7  ;;  %v61_v34 = vld [vmem:[%s221_s2] sm:$0x1]  ;;  %s127_s1 = scalar_lea.vmem %s88_s30, 256  ;;  %p132_p9 = scmp.lt.s32.totalorder %s88_s30, %s88_s30 }
  0x16   :  { %v44_v7 = vsel %vm31_vm0, %v42_v4, 0.0  ;;  %v45_v8 = vsel %vm31_vm0, %v43_v5, 0.0  ;;  %p128_p8 = scmp.ne.s32.totalorder %s88_s30, %s127_s1  ;;  %p133_p10 = scmp.lt.s32.totalorder %s127_s1, %s127_s1 }
  0x17   :  { %v35_v9 = vrot.slane %v34_v6, 4  ;;  %v46_v10 = vadd.f32 %v45_v8, %v44_v7  ;;  %v67_v31 = vsub.s32 0, %v66_v29 }
  0x18   :  { %p134_p11 = por %p133_p10, %p132_p9 }
  0x19   :  { %v36_v11 = vadd.f32 %v35_v9, %v34_v6  ;;  %v47_v12 = vrot.slane %v46_v10, 4 }
  0x1a   :  { %p135_p12 = pnand %p134_p11, %p128_p8 }
  0x1b   :  { %v37_v13 = vrot.slane %v36_v11, 2  ;;  %v48_v14 = vadd.f32 %v47_v12, %v46_v10 }
  0x1d   :  { %v38_v15 = vadd.f32 %v37_v13, %v36_v11  ;;  %v49_v16 = vrot.slane %v48_v14, 2 }
  0x1f   :  { %v39_v17 = vrot.slane %v38_v15, 1  ;;  %v50_v18 = vadd.f32 %v49_v16, %v48_v14 }
  0x21   :  { %v40_v19 = vadd.f32 %v39_v17, %v38_v15  ;;  %v51_v20 = vrot.slane %v50_v18, 1 }
  0x23   :  { %v41_v21 = vmul.f32 0.0625, %v40_v19  ;;  %v52_v22 = vadd.f32 %v51_v20, %v50_v18 }
  0x25   :  { %v53_v23 = vmul.f32 0.0625, %v52_v22  ;;  %v54_v24 = vmul.f32 %v41_v21, %v41_v21 }
  0x27   :  { %v55_v25 = vsub.f32 %v53_v23, %v54_v24 }
  0x29   :  { %v56_v26 = vmax.f32 %v55_v25, 0.0 }
  0x2b   :  { %v57_v27 = vadd.f32 1e-05, %v56_v26 }
  0x2d   :  { %103 = vrsqrt.f32 %v57_v27 }
  0x37   :  { %v104_v32 = vpop.eup %103 }
  0x38   :  { %v60_v33 = vmul.f32 %v104_v32, %v59_v30 }
  0x3a   :  { %v62_v35 = vmul.f32 %v60_v33, %v41_v21  ;;  %v68_v36 = vrot.slane %v60_v33, %v67_v31 }
  0x3c   :  { %v63_v37 = vsub.f32 %v61_v34, %v62_v35  ;;  %v70_v38 = vmul.f32 %v68_v36, %v29_v0  ;;  %v71_v39 = vmul.f32 %v68_v36, %v30_v1 }
  0x3e   :  { %v76_v40 = vrot.slane %v63_v37, %v67_v31 }
  0x40   :  { %v78_v41 = vadd.f32 %v76_v40, %v70_v38  ;;  %v79_v42 = vadd.f32 %v76_v40, %v71_v39 }
  0x42   :  { %80 = vst.msk [vmem:[#allocation5] sm:$0xff] %vm31_vm0, %v78_v41  ;;  %81 = vst.msk [vmem:[#allocation5 + $0x8] sm:$0xff] %vm31_vm0, %v79_v42 }
  0x43   :  { %138 = shalt.err (!%p135_p12)
}
  0x44   :  { %s139_s5 = scalar_lea.hbm %s222_s3, 256 }
  0x45   :  { %p140_p13 = scmp.ne.s32.totalorder %s222_s3, %s139_s5  ;;  %p143_p0 = scmp.lt.u32.totalorder %s139_s5, %s222_s3 }
  0x47   :  { %p145_p1 = pnand %p143_p0, %p140_p13 }
  0x49   :  { %148 = shalt.err (!%p145_p1)
}
  0x4a   :  { %93 = dma.vmem_to_hbm [thread:$0]  %s88_s30, 256, %s222_s3, [#allocation4], %s154_s22, %s154_s22, %s155_s23  }
  0x4b   :  { %151 = dma.done.wait [#allocation4], 256  }
  0x4c   :  { %152 = vsyncadd [#allocation4], 4294967040 }
  0x4d   :  { %97 = vsyncpa [#allocation3], 1 }
  0x4e   :  { %98 = vsyncpa [#allocation4], 1 }

</bundles_post_ra>
